<compile_context>
chip_gen: v7x
topology: tpu7x:2x2x1
jax: 0.10.0
libtpu: 0.0.40
codegen_flags: <defaults>
</compile_context>

<pallas_src>
import functools

import jax
import jax.numpy as jnp
from jax.experimental import pallas as pl
from jax.experimental.pallas import tpu as pltpu


def _csa_kernel(x_ref, w1t_ref, b1r_ref, w2t_ref, b2r_ref, wsp_ref, out_ref, *, H, W):
    Nb, C, HW = x_ref.shape

    # NOTE: for bf16 activations on v6e/v7x the x*ca and xs*sa passes could stay
    # in bf16 to halve VMEM traffic; kept f32 here to match the f32 reference.
    x = x_ref[...].astype(jnp.float32)                      # (Nb, C, HW) lane-dense

    # ---------------- channel attention (batched 1x1-conv MLP) ----------------
    avg_c = jnp.mean(x, axis=2)                             # (Nb, C)  AdaptiveAvgPool2d(1)
    max_c = jnp.max(x, axis=2)                              # (Nb, C)  AdaptiveMaxPool2d(1)
    stats = jnp.concatenate([avg_c, max_c], axis=0)         # (2*Nb, C)

    # fc1 + ReLU for all avg/max rows in one MXU matmul.
    h = jnp.maximum(
        jnp.dot(stats, w1t_ref[...], preferred_element_type=jnp.float32)
        + b1r_ref[...], 0.0)                                # (2*Nb, Cr)
    # fc2 is linear: fc2(h_avg) + fc2(h_max) = (h_avg + h_max) @ W2^T + 2*b2
    h_fold = h[:Nb] + h[Nb:]                                # (Nb, Cr)
    logits = (jnp.dot(h_fold, w2t_ref[...], preferred_element_type=jnp.float32)
              + 2.0 * b2r_ref[...])                         # (Nb, C)
    ca = jax.nn.sigmoid(logits)                             # (Nb, C) channel gate

    xs = x * ca[:, :, None]                                 # channel-rescaled features

    # ---------------- spatial attention ----------------
    mean_map = jnp.mean(xs, axis=1)                         # (Nb, HW) mean over channels
    max_map = jnp.max(xs, axis=1)                           # (Nb, HW) max  over channels
    maps = jnp.concatenate([mean_map, max_map], axis=0)     # (2*Nb, HW) stacked maps

    # Exact flat-index -> (h, w): float estimate + one-step integer correction
    # (exact for any H*W < 2^24; runs once per grid step, cost is nil).
    colf = jax.lax.broadcasted_iota(jnp.int32, (1, HW), 1).astype(jnp.float32)
    h_est = jnp.floor((colf + 0.5) / float(W))
    w_est = colf - h_est * float(W)
    h_idx = jnp.where(w_est < 0.0, h_est - 1.0,
                      jnp.where(w_est >= float(W), h_est + 1.0, h_est))
    w_idx = colf - h_idx * float(W)

    # 3x3 conv taps + bias from SMEM (scalar reads).
    w_avg = [wsp_ref[k] for k in range(9)]                  # taps on the mean map
    w_max = [wsp_ref[9 + k] for k in range(9)]              # taps on the max map
    b_sp = wsp_ref[18]

    # Row selector: first Nb rows of `maps` are mean maps, last Nb are max maps.
    row_is_mean = jax.lax.broadcasted_iota(jnp.int32, (2 * Nb, 1), 0) < Nb

    # 3x3 'SAME' conv on the stacked maps via XLU rolls + border-validity masks.
    acc = None
    for i in range(3):
        for j in range(3):
            kh, kw = i - 1, j - 1
            k = i * 3 + j
            shift = (-(kh * W + kw)) % HW
            rolled = maps if shift == 0 else pltpu.roll(maps, shift, axis=1)
            coef = jnp.where(row_is_mean, w_avg[k], w_max[k])   # (2*Nb, 1) per-row tap
            tap = coef * rolled
            conds = []
            if kh == -1:
                conds.append(h_idx >= 0.5)
            elif kh == 1:
                conds.append(h_idx <= float(H) - 1.5)
            if kw == -1:
                conds.append(w_idx >= 0.5)
            elif kw == 1:
                conds.append(w_idx <= float(W) - 1.5)
            mask = None
            for c in conds:
                mask = c if mask is None else jnp.logical_and(mask, c)
            if mask is not None:
                tap = jnp.where(mask, tap, 0.0)
            acc = tap if acc is None else acc + tap

    sa = jax.nn.sigmoid(acc[:Nb] + acc[Nb:] + b_sp)         # (Nb, HW) spatial gate
    out_ref[...] = (xs * sa[:, None, :]).astype(out_ref.dtype)


def channel_spatial_attention(x, W1, b1, W2, b2, Wsp, bsp, *,
                              max_block_bytes=4 * 1024 * 1024):
    """x: (N, C, H, W) f32.  W1: (Cr, C, 1, 1), b1: (Cr,), W2: (C, Cr, 1, 1),
    b2: (C,), Wsp: (1, 2, 3, 3), bsp: (1,)."""
    N, C, H, Wd = x.shape
    Cr = W1.shape[0]
    HW = H * Wd

    # Lane-dense activation view; weights pre-transposed for row-major matmuls.
    x3 = x.reshape(N, C, HW)
    w1t = W1.reshape(Cr, C).T.astype(jnp.float32)           # (C, Cr)
    w2t = W2.reshape(C, Cr).T.astype(jnp.float32)           # (Cr, C)
    b1r = b1.reshape(1, Cr).astype(jnp.float32)
    b2r = b2.reshape(1, C).astype(jnp.float32)
    # spatial conv taps flattened: [w(mean,3x3), w(max,3x3), bias] -> (19,) in SMEM
    wsp = jnp.concatenate(
        [Wsp[0, 0].ravel(), Wsp[0, 1].ravel(), bsp.ravel()]).astype(jnp.float32)

    # Samples per grid step: largest divisor of N keeping the block <= ~4 MiB,
    # but prefer a grid of >= 2 steps (keeps both v7x TensorCores busy and the
    # DMA/compute pipeline primed).
    per_sample_bytes = C * HW * x.dtype.itemsize
    candidates = [nb for nb in range(1, N + 1)
                  if N % nb == 0 and nb * per_sample_bytes <= max_block_bytes]
    if candidates:
        multi = [nb for nb in candidates if N // nb >= 2]
        Nb = max(multi) if multi else max(candidates)
    else:
        Nb = 1
        # TODO(synk): samples whose C*H*W exceeds the VMEM budget (hits first on
        # v7x's 64 MiB) need an HW-tiled grid axis with two-pass channel stats
        # and a halo'd spatial conv; whole-sample blocks are used here.

    grid_spec = pltpu.PrefetchScalarGridSpec(
        num_scalar_prefetch=0,
        grid=(N // Nb,),
        in_specs=[
            pl.BlockSpec((Nb, C, HW), lambda n: (n, 0, 0)),     # x (lane-dense)
            pl.BlockSpec((C, Cr), lambda n: (0, 0)),            # fc1 weight (transposed)
            pl.BlockSpec((1, Cr), lambda n: (0, 0)),            # fc1 bias (row)
            pl.BlockSpec((Cr, C), lambda n: (0, 0)),            # fc2 weight (transposed)
            pl.BlockSpec((1, C), lambda n: (0, 0)),             # fc2 bias (row)
            pl.BlockSpec(memory_space=pltpu.MemorySpace.SMEM),  # conv taps + bias
        ],
        out_specs=pl.BlockSpec((Nb, C, HW), lambda n: (n, 0, 0)),
    )

    out3 = pl.pallas_call(
        functools.partial(_csa_kernel, H=H, W=Wd),
        out_shape=jax.ShapeDtypeStruct((N, C, HW), x.dtype),
        grid_spec=grid_spec,
        compiler_params=pltpu.CompilerParams(
            dimension_semantics=("parallel",),
            vmem_limit_bytes=32 * 1024 * 1024),
    )(x3, w1t, b1r, w2t, b2r, wsp)
    return out3.reshape(N, C, H, Wd)


def reference(x, W1, b1, W2, b2, Wsp, bsp):
    """Pure-JAX reference matching the PyTorch forward exactly."""
    w1 = W1.reshape(W1.shape[0], W1.shape[1])
    w2 = W2.reshape(W2.shape[0], W2.shape[1])
    avg = x.mean(axis=(2, 3))
    mx = x.max(axis=(2, 3))

    def mlp(v):
        h = jnp.maximum(v @ w1.T + b1, 0.0)
        return h @ w2.T + b2

    ca = jax.nn.sigmoid(mlp(avg) + mlp(mx))
    xs = x * ca[:, :, None, None]
    cat = jnp.concatenate(
        [xs.mean(axis=1, keepdims=True), xs.max(axis=1, keepdims=True)], axis=1)
    sa = jax.lax.conv_general_dilated(
        cat, Wsp, window_strides=(1, 1), padding=((1, 1), (1, 1)),
        dimension_numbers=("NCHW", "OIHW", "NCHW"))
    sa = jax.nn.sigmoid(sa + bsp.reshape(1, 1, 1, 1))
    return xs * sa


if __name__ == "__main__":
    N, C, H, W = 2, 4, 16, 16
    reduction = 2
    Cr = C // reduction

    key = jax.random.PRNGKey(0)
    ks = jax.random.split(key, 7)
    x = jax.random.normal(ks[0], (N, C, H, W), jnp.float32)
    W1 = jax.random.normal(ks[1], (Cr, C, 1, 1), jnp.float32) * 0.5
    b1 = jax.random.normal(ks[2], (Cr,), jnp.float32) * 0.1
    W2 = jax.random.normal(ks[3], (C, Cr, 1, 1), jnp.float32) * 0.5
    b2 = jax.random.normal(ks[4], (C,), jnp.float32) * 0.1
    Wsp = jax.random.normal(ks[5], (1, 2, 3, 3), jnp.float32) * 0.5
    bsp = jax.random.normal(ks[6], (1,), jnp.float32) * 0.1

    out = channel_spatial_attention(x, W1, b1, W2, b2, Wsp, bsp)
    out = jax.block_until_ready(out)

    ref = reference(x, W1, b1, W2, b2, Wsp, bsp)
    assert out.shape == ref.shape and out.dtype == ref.dtype
    max_err = float(jnp.max(jnp.abs(out - ref)))
    if max_err > 1e-3:
        raise AssertionError(f"mismatch vs reference, max abs err = {max_err}")
    print("KERNEL_OK")
</pallas_src>

<mosaic_0001>
module attributes {stable_mosaic.version = 11 : i64} {
  func.func @_csa_kernel(%arg0: i32, %arg1: memref<1x4x256xf32, #tpu.memory_space<vmem>>, %arg2: memref<4x2xf32, #tpu.memory_space<vmem>>, %arg3: memref<1x2xf32, #tpu.memory_space<vmem>>, %arg4: memref<2x4xf32, #tpu.memory_space<vmem>>, %arg5: memref<1x4xf32, #tpu.memory_space<vmem>>, %arg6: memref<19xf32, #tpu.memory_space<smem>>, %arg7: memref<1x4x256xf32, #tpu.memory_space<vmem>>) attributes {dimension_semantics = [#tpu.dimension_semantics<parallel>], iteration_bounds = array<i64: 2>, scalar_prefetch = 0 : i64, scratch_operands = 0 : i64, tpu.core_type = #tpu.core_type<tc>, window_params = [{transform_indices = @transform_0, window_bounds = array<i64: 1, 4, 256>}, {pipeline_mode = #tpu.pipeline_mode<synchronous>, transform_indices = @transform_1, window_bounds = array<i64: 4, 2>}, {pipeline_mode = #tpu.pipeline_mode<synchronous>, transform_indices = @transform_2, window_bounds = array<i64: 1, 2>}, {pipeline_mode = #tpu.pipeline_mode<synchronous>, transform_indices = @transform_3, window_bounds = array<i64: 2, 4>}, {pipeline_mode = #tpu.pipeline_mode<synchronous>, transform_indices = @transform_4, window_bounds = array<i64: 1, 4>}, {transform_indices = @transform_5, window_bounds = array<i64: 19>}, {transform_indices = @transform_6, window_bounds = array<i64: 1, 4, 256>}]} {
    %c0 = arith.constant 0 : index
    %c0_0 = arith.constant 0 : index
    %c0_1 = arith.constant 0 : index
    %0 = vector.load %arg1[%c0, %c0_0, %c0_1] : memref<1x4x256xf32, #tpu.memory_space<vmem>>, vector<1x4x256xf32>
    %cst = arith.constant dense<0.000000e+00> : vector<1x4xf32>
    %1 = vector.multi_reduction <add>, %0, %cst [2] : vector<1x4x256xf32> to vector<1x4xf32>
    %cst_2 = arith.constant 2.560000e+02 : f32
    %2 = vector.broadcast %cst_2 : f32 to vector<1x4xf32>
    %3 = arith.divf %1, %2 : vector<1x4xf32>
    %cst_3 = arith.constant dense<0xFF800000> : vector<1x4xf32>
    %4 = vector.multi_reduction <maximumf>, %0, %cst_3 [2] : vector<1x4x256xf32> to vector<1x4xf32>
    %5 = tpu.concatenate %3, %4 in 0 : vector<1x4xf32>, vector<1x4xf32> -> vector<2x4xf32>
    %c0_4 = arith.constant 0 : index
    %c0_5 = arith.constant 0 : index
    %6 = vector.load %arg2[%c0_4, %c0_5] : memref<4x2xf32, #tpu.memory_space<vmem>>, vector<4x2xf32>
    %cst_6 = arith.constant dense<0.000000e+00> : vector<2x2xf32>
    %7 = tpu.matmul %5, %6, %cst_6 {dimension_numbers = #tpu.dot_dimension_numbers<[1], [0], [0], [1], [0, 0, 1, 1], [], []>} : vector<2x4xf32>, vector<4x2xf32>, vector<2x2xf32> -> vector<2x2xf32>
    %c0_7 = arith.constant 0 : index
    %c0_8 = arith.constant 0 : index
    %8 = vector.load %arg3[%c0_7, %c0_8] : memref<1x2xf32, #tpu.memory_space<vmem>>, vector<1x2xf32>
    %9 = vector.broadcast %8 : vector<1x2xf32> to vector<2x2xf32>
    %10 = arith.addf %7, %9 : vector<2x2xf32>
    %cst_9 = arith.constant 0.000000e+00 : f32
    %11 = vector.broadcast %cst_9 : f32 to vector<2x2xf32>
    %12 = arith.maximumf %10, %11 : vector<2x2xf32>
    %13 = vector.extract_strided_slice %12 {offsets = [0, 0], sizes = [1, 2], strides = [1, 1]} : vector<2x2xf32> to vector<1x2xf32>
    %14 = vector.extract_strided_slice %12 {offsets = [1, 0], sizes = [1, 2], strides = [1, 1]} : vector<2x2xf32> to vector<1x2xf32>
    %15 = arith.addf %13, %14 : vector<1x2xf32>
    %c0_10 = arith.constant 0 : index
    %c0_11 = arith.constant 0 : index
    %16 = vector.load %arg4[%c0_10, %c0_11] : memref<2x4xf32, #tpu.memory_space<vmem>>, vector<2x4xf32>
    %cst_12 = arith.constant dense<0.000000e+00> : vector<1x4xf32>
    %17 = tpu.matmul %15, %16, %cst_12 {dimension_numbers = #tpu.dot_dimension_numbers<[1], [0], [0], [1], [0, 0, 1, 1], [], []>} : vector<1x2xf32>, vector<2x4xf32>, vector<1x4xf32> -> vector<1x4xf32>
    %c0_13 = arith.constant 0 : index
    %c0_14 = arith.constant 0 : index
    %18 = vector.load %arg5[%c0_13, %c0_14] : memref<1x4xf32, #tpu.memory_space<vmem>>, vector<1x4xf32>
    %cst_15 = arith.constant 2.000000e+00 : f32
    %19 = vector.broadcast %cst_15 : f32 to vector<1x4xf32>
    %20 = arith.mulf %19, %18 : vector<1x4xf32>
    %21 = arith.addf %17, %20 : vector<1x4xf32>
    %22 = arith.negf %21 : vector<1x4xf32>
    %23 = math.exp %22 : vector<1x4xf32>
    %cst_16 = arith.constant 1.000000e+00 : f32
    %24 = vector.broadcast %cst_16 : f32 to vector<1x4xf32>
    %25 = arith.addf %24, %23 : vector<1x4xf32>
    %26 = arith.divf %24, %25 : vector<1x4xf32>
    %27 = vector.shape_cast %26 : vector<1x4xf32> to vector<1x4x1xf32>
    %28 = vector.broadcast %27 : vector<1x4x1xf32> to vector<1x4x256xf32>
    %29 = arith.mulf %0, %28 : vector<1x4x256xf32>
    %cst_17 = arith.constant dense<0.000000e+00> : vector<1x256xf32>
    %30 = vector.multi_reduction <add>, %29, %cst_17 [1] : vector<1x4x256xf32> to vector<1x256xf32>
    %cst_18 = arith.constant 4.000000e+00 : f32
    %31 = vector.broadcast %cst_18 : f32 to vector<1x256xf32>
    %32 = arith.divf %30, %31 : vector<1x256xf32>
    %cst_19 = arith.constant dense<0xFF800000> : vector<1x256xf32>
    %33 = vector.multi_reduction <maximumf>, %29, %cst_19 [1] : vector<1x4x256xf32> to vector<1x256xf32>
    %34 = tpu.concatenate %32, %33 in 0 : vector<1x256xf32>, vector<1x256xf32> -> vector<2x256xf32>
    %35 = tpu.iota {dimensions = array<i32: 1>} : vector<1x256xi32>
    %36 = arith.sitofp %35 : vector<1x256xi32> to vector<1x256xf32>
    %cst_20 = arith.constant 5.000000e-01 : f32
    %37 = vector.broadcast %cst_20 : f32 to vector<1x256xf32>
    %38 = arith.addf %36, %37 : vector<1x256xf32>
    %cst_21 = arith.constant 1.600000e+01 : f32
    %39 = vector.broadcast %cst_21 : f32 to vector<1x256xf32>
    %40 = arith.divf %38, %39 : vector<1x256xf32>
    %41 = math.floor %40 : vector<1x256xf32>
    %cst_22 = arith.constant 1.600000e+01 : f32
    %42 = vector.broadcast %cst_22 : f32 to vector<1x256xf32>
    %43 = arith.mulf %41, %42 : vector<1x256xf32>
    %44 = arith.subf %36, %43 : vector<1x256xf32>
    %cst_23 = arith.constant 0.000000e+00 : f32
    %45 = vector.broadcast %cst_23 : f32 to vector<1x256xf32>
    %46 = arith.cmpf olt, %44, %45 : vector<1x256xf32>
    %cst_24 = arith.constant 1.000000e+00 : f32
    %47 = vector.broadcast %cst_24 : f32 to vector<1x256xf32>
    %48 = arith.subf %41, %47 : vector<1x256xf32>
    %cst_25 = arith.constant 1.600000e+01 : f32
    %49 = vector.broadcast %cst_25 : f32 to vector<1x256xf32>
    %50 = arith.cmpf oge, %44, %49 : vector<1x256xf32>
    %cst_26 = arith.constant 1.000000e+00 : f32
    %51 = vector.broadcast %cst_26 : f32 to vector<1x256xf32>
    %52 = arith.addf %41, %51 : vector<1x256xf32>
    %53 = arith.select %50, %52, %41 : vector<1x256xi1>, vector<1x256xf32>
    %54 = arith.select %46, %48, %53 : vector<1x256xi1>, vector<1x256xf32>
    %cst_27 = arith.constant 1.600000e+01 : f32
    %55 = vector.broadcast %cst_27 : f32 to vector<1x256xf32>
    %56 = arith.mulf %54, %55 : vector<1x256xf32>
    %57 = arith.subf %36, %56 : vector<1x256xf32>
    %c0_28 = arith.constant 0 : index
    %58 = memref.load %arg6[%c0_28] : memref<19xf32, #tpu.memory_space<smem>>
    %c1 = arith.constant 1 : index
    %59 = memref.load %arg6[%c1] : memref<19xf32, #tpu.memory_space<smem>>
    %c2 = arith.constant 2 : index
    %60 = memref.load %arg6[%c2] : memref<19xf32, #tpu.memory_space<smem>>
    %c3 = arith.constant 3 : index
    %61 = memref.load %arg6[%c3] : memref<19xf32, #tpu.memory_space<smem>>
    %c4 = arith.constant 4 : index
    %62 = memref.load %arg6[%c4] : memref<19xf32, #tpu.memory_space<smem>>
    %c5 = arith.constant 5 : index
    %63 = memref.load %arg6[%c5] : memref<19xf32, #tpu.memory_space<smem>>
    %c6 = arith.constant 6 : index
    %64 = memref.load %arg6[%c6] : memref<19xf32, #tpu.memory_space<smem>>
    %c7 = arith.constant 7 : index
    %65 = memref.load %arg6[%c7] : memref<19xf32, #tpu.memory_space<smem>>
    %c8 = arith.constant 8 : index
    %66 = memref.load %arg6[%c8] : memref<19xf32, #tpu.memory_space<smem>>
    %c9 = arith.constant 9 : index
    %67 = memref.load %arg6[%c9] : memref<19xf32, #tpu.memory_space<smem>>
    %c10 = arith.constant 10 : index
    %68 = memref.load %arg6[%c10] : memref<19xf32, #tpu.memory_space<smem>>
    %c11 = arith.constant 11 : index
    %69 = memref.load %arg6[%c11] : memref<19xf32, #tpu.memory_space<smem>>
    %c12 = arith.constant 12 : index
    %70 = memref.load %arg6[%c12] : memref<19xf32, #tpu.memory_space<smem>>
    %c13 = arith.constant 13 : index
    %71 = memref.load %arg6[%c13] : memref<19xf32, #tpu.memory_space<smem>>
    %c14 = arith.constant 14 : index
    %72 = memref.load %arg6[%c14] : memref<19xf32, #tpu.memory_space<smem>>
    %c15 = arith.constant 15 : index
    %73 = memref.load %arg6[%c15] : memref<19xf32, #tpu.memory_space<smem>>
    %c16 = arith.constant 16 : index
    %74 = memref.load %arg6[%c16] : memref<19xf32, #tpu.memory_space<smem>>
    %c17 = arith.constant 17 : index
    %75 = memref.load %arg6[%c17] : memref<19xf32, #tpu.memory_space<smem>>
    %c18 = arith.constant 18 : index
    %76 = memref.load %arg6[%c18] : memref<19xf32, #tpu.memory_space<smem>>
    %77 = tpu.iota {dimensions = array<i32: 0>} : vector<2x1xi32>
    %c1_i32 = arith.constant 1 : i32
    %78 = vector.broadcast %c1_i32 : i32 to vector<2x1xi32>
    %79 = arith.cmpi slt, %77, %78 : vector<2x1xi32>
    %c17_i32 = arith.constant 17 : i32
    %80 = tpu.dynamic_rotate %34 by %c17_i32 dim 1 : vector<2x256xf32>, i32 -> vector<2x256xf32>
    %81 = vector.broadcast %58 : f32 to vector<2x1xf32>
    %82 = vector.broadcast %67 : f32 to vector<2x1xf32>
    %83 = arith.select %79, %81, %82 : vector<2x1xi1>, vector<2x1xf32>
    %84 = vector.broadcast %83 : vector<2x1xf32> to vector<2x256xf32>
    %85 = arith.mulf %84, %80 : vector<2x256xf32>
    %cst_29 = arith.constant 5.000000e-01 : f32
    %86 = vector.broadcast %cst_29 : f32 to vector<1x256xf32>
    %87 = arith.cmpf oge, %54, %86 : vector<1x256xf32>
    %cst_30 = arith.constant 5.000000e-01 : f32
    %88 = vector.broadcast %cst_30 : f32 to vector<1x256xf32>
    %89 = arith.cmpf oge, %57, %88 : vector<1x256xf32>
    %90 = arith.andi %87, %89 : vector<1x256xi1>
    %cst_31 = arith.constant 0.000000e+00 : f32
    %91 = vector.shape_cast %90 : vector<1x256xi1> to vector<1x256xi1>
    %92 = vector.broadcast %91 : vector<1x256xi1> to vector<2x256xi1>
    %93 = vector.broadcast %cst_31 : f32 to vector<2x256xf32>
    %94 = arith.select %92, %85, %93 : vector<2x256xi1>, vector<2x256xf32>
    %c16_i32 = arith.constant 16 : i32
    %95 = tpu.dynamic_rotate %34 by %c16_i32 dim 1 : vector<2x256xf32>, i32 -> vector<2x256xf32>
    %96 = vector.broadcast %59 : f32 to vector<2x1xf32>
    %97 = vector.broadcast %68 : f32 to vector<2x1xf32>
    %98 = arith.select %79, %96, %97 : vector<2x1xi1>, vector<2x1xf32>
    %99 = vector.broadcast %98 : vector<2x1xf32> to vector<2x256xf32>
    %100 = arith.mulf %99, %95 : vector<2x256xf32>
    %cst_32 = arith.constant 5.000000e-01 : f32
    %101 = vector.broadcast %cst_32 : f32 to vector<1x256xf32>
    %102 = arith.cmpf oge, %54, %101 : vector<1x256xf32>
    %cst_33 = arith.constant 0.000000e+00 : f32
    %103 = vector.shape_cast %102 : vector<1x256xi1> to vector<1x256xi1>
    %104 = vector.broadcast %103 : vector<1x256xi1> to vector<2x256xi1>
    %105 = vector.broadcast %cst_33 : f32 to vector<2x256xf32>
    %106 = arith.select %104, %100, %105 : vector<2x256xi1>, vector<2x256xf32>
    %107 = arith.addf %94, %106 : vector<2x256xf32>
    %c15_i32 = arith.constant 15 : i32
    %108 = tpu.dynamic_rotate %34 by %c15_i32 dim 1 : vector<2x256xf32>, i32 -> vector<2x256xf32>
    %109 = vector.broadcast %60 : f32 to vector<2x1xf32>
    %110 = vector.broadcast %69 : f32 to vector<2x1xf32>
    %111 = arith.select %79, %109, %110 : vector<2x1xi1>, vector<2x1xf32>
    %112 = vector.broadcast %111 : vector<2x1xf32> to vector<2x256xf32>
    %113 = arith.mulf %112, %108 : vector<2x256xf32>
    %cst_34 = arith.constant 5.000000e-01 : f32
    %114 = vector.broadcast %cst_34 : f32 to vector<1x256xf32>
    %115 = arith.cmpf oge, %54, %114 : vector<1x256xf32>
    %cst_35 = arith.constant 1.450000e+01 : f32
    %116 = vector.broadcast %cst_35 : f32 to vector<1x256xf32>
    %117 = arith.cmpf ole, %57, %116 : vector<1x256xf32>
    %118 = arith.andi %115, %117 : vector<1x256xi1>
    %cst_36 = arith.constant 0.000000e+00 : f32
    %119 = vector.shape_cast %118 : vector<1x256xi1> to vector<1x256xi1>
    %120 = vector.broadcast %119 : vector<1x256xi1> to vector<2x256xi1>
    %121 = vector.broadcast %cst_36 : f32 to vector<2x256xf32>
    %122 = arith.select %120, %113, %121 : vector<2x256xi1>, vector<2x256xf32>
    %123 = arith.addf %107, %122 : vector<2x256xf32>
    %c1_i32_37 = arith.constant 1 : i32
    %124 = tpu.dynamic_rotate %34 by %c1_i32_37 dim 1 : vector<2x256xf32>, i32 -> vector<2x256xf32>
    %125 = vector.broadcast %61 : f32 to vector<2x1xf32>
    %126 = vector.broadcast %70 : f32 to vector<2x1xf32>
    %127 = arith.select %79, %125, %126 : vector<2x1xi1>, vector<2x1xf32>
    %128 = vector.broadcast %127 : vector<2x1xf32> to vector<2x256xf32>
    %129 = arith.mulf %128, %124 : vector<2x256xf32>
    %cst_38 = arith.constant 5.000000e-01 : f32
    %130 = vector.broadcast %cst_38 : f32 to vector<1x256xf32>
    %131 = arith.cmpf oge, %57, %130 : vector<1x256xf32>
    %cst_39 = arith.constant 0.000000e+00 : f32
    %132 = vector.shape_cast %131 : vector<1x256xi1> to vector<1x256xi1>
    %133 = vector.broadcast %132 : vector<1x256xi1> to vector<2x256xi1>
    %134 = vector.broadcast %cst_39 : f32 to vector<2x256xf32>
    %135 = arith.select %133, %129, %134 : vector<2x256xi1>, vector<2x256xf32>
    %136 = arith.addf %123, %135 : vector<2x256xf32>
    %137 = vector.broadcast %62 : f32 to vector<2x1xf32>
    %138 = vector.broadcast %71 : f32 to vector<2x1xf32>
    %139 = arith.select %79, %137, %138 : vector<2x1xi1>, vector<2x1xf32>
    %140 = vector.broadcast %139 : vector<2x1xf32> to vector<2x256xf32>
    %141 = arith.mulf %140, %34 : vector<2x256xf32>
    %142 = arith.addf %136, %141 : vector<2x256xf32>
    %c255_i32 = arith.constant 255 : i32
    %143 = tpu.dynamic_rotate %34 by %c255_i32 dim 1 : vector<2x256xf32>, i32 -> vector<2x256xf32>
    %144 = vector.broadcast %63 : f32 to vector<2x1xf32>
    %145 = vector.broadcast %72 : f32 to vector<2x1xf32>
    %146 = arith.select %79, %144, %145 : vector<2x1xi1>, vector<2x1xf32>
    %147 = vector.broadcast %146 : vector<2x1xf32> to vector<2x256xf32>
    %148 = arith.mulf %147, %143 : vector<2x256xf32>
    %cst_40 = arith.constant 1.450000e+01 : f32
    %149 = vector.broadcast %cst_40 : f32 to vector<1x256xf32>
    %150 = arith.cmpf ole, %57, %149 : vector<1x256xf32>
    %cst_41 = arith.constant 0.000000e+00 : f32
    %151 = vector.shape_cast %150 : vector<1x256xi1> to vector<1x256xi1>
    %152 = vector.broadcast %151 : vector<1x256xi1> to vector<2x256xi1>
    %153 = vector.broadcast %cst_41 : f32 to vector<2x256xf32>
    %154 = arith.select %152, %148, %153 : vector<2x256xi1>, vector<2x256xf32>
    %155 = arith.addf %142, %154 : vector<2x256xf32>
    %c241_i32 = arith.constant 241 : i32
    %156 = tpu.dynamic_rotate %34 by %c241_i32 dim 1 : vector<2x256xf32>, i32 -> vector<2x256xf32>
    %157 = vector.broadcast %64 : f32 to vector<2x1xf32>
    %158 = vector.broadcast %73 : f32 to vector<2x1xf32>
    %159 = arith.select %79, %157, %158 : vector<2x1xi1>, vector<2x1xf32>
    %160 = vector.broadcast %159 : vector<2x1xf32> to vector<2x256xf32>
    %161 = arith.mulf %160, %156 : vector<2x256xf32>
    %cst_42 = arith.constant 1.450000e+01 : f32
    %162 = vector.broadcast %cst_42 : f32 to vector<1x256xf32>
    %163 = arith.cmpf ole, %54, %162 : vector<1x256xf32>
    %cst_43 = arith.constant 5.000000e-01 : f32
    %164 = vector.broadcast %cst_43 : f32 to vector<1x256xf32>
    %165 = arith.cmpf oge, %57, %164 : vector<1x256xf32>
    %166 = arith.andi %163, %165 : vector<1x256xi1>
    %cst_44 = arith.constant 0.000000e+00 : f32
    %167 = vector.shape_cast %166 : vector<1x256xi1> to vector<1x256xi1>
    %168 = vector.broadcast %167 : vector<1x256xi1> to vector<2x256xi1>
    %169 = vector.broadcast %cst_44 : f32 to vector<2x256xf32>
    %170 = arith.select %168, %161, %169 : vector<2x256xi1>, vector<2x256xf32>
    %171 = arith.addf %155, %170 : vector<2x256xf32>
    %c240_i32 = arith.constant 240 : i32
    %172 = tpu.dynamic_rotate %34 by %c240_i32 dim 1 : vector<2x256xf32>, i32 -> vector<2x256xf32>
    %173 = vector.broadcast %65 : f32 to vector<2x1xf32>
    %174 = vector.broadcast %74 : f32 to vector<2x1xf32>
    %175 = arith.select %79, %173, %174 : vector<2x1xi1>, vector<2x1xf32>
    %176 = vector.broadcast %175 : vector<2x1xf32> to vector<2x256xf32>
    %177 = arith.mulf %176, %172 : vector<2x256xf32>
    %cst_45 = arith.constant 1.450000e+01 : f32
    %178 = vector.broadcast %cst_45 : f32 to vector<1x256xf32>
    %179 = arith.cmpf ole, %54, %178 : vector<1x256xf32>
    %cst_46 = arith.constant 0.000000e+00 : f32
    %180 = vector.shape_cast %179 : vector<1x256xi1> to vector<1x256xi1>
    %181 = vector.broadcast %180 : vector<1x256xi1> to vector<2x256xi1>
    %182 = vector.broadcast %cst_46 : f32 to vector<2x256xf32>
    %183 = arith.select %181, %177, %182 : vector<2x256xi1>, vector<2x256xf32>
    %184 = arith.addf %171, %183 : vector<2x256xf32>
    %c239_i32 = arith.constant 239 : i32
    %185 = tpu.dynamic_rotate %34 by %c239_i32 dim 1 : vector<2x256xf32>, i32 -> vector<2x256xf32>
    %186 = vector.broadcast %66 : f32 to vector<2x1xf32>
    %187 = vector.broadcast %75 : f32 to vector<2x1xf32>
    %188 = arith.select %79, %186, %187 : vector<2x1xi1>, vector<2x1xf32>
    %189 = vector.broadcast %188 : vector<2x1xf32> to vector<2x256xf32>
    %190 = arith.mulf %189, %185 : vector<2x256xf32>
    %cst_47 = arith.constant 1.450000e+01 : f32
    %191 = vector.broadcast %cst_47 : f32 to vector<1x256xf32>
    %192 = arith.cmpf ole, %54, %191 : vector<1x256xf32>
    %cst_48 = arith.constant 1.450000e+01 : f32
    %193 = vector.broadcast %cst_48 : f32 to vector<1x256xf32>
    %194 = arith.cmpf ole, %57, %193 : vector<1x256xf32>
    %195 = arith.andi %192, %194 : vector<1x256xi1>
    %cst_49 = arith.constant 0.000000e+00 : f32
    %196 = vector.shape_cast %195 : vector<1x256xi1> to vector<1x256xi1>
    %197 = vector.broadcast %196 : vector<1x256xi1> to vector<2x256xi1>
    %198 = vector.broadcast %cst_49 : f32 to vector<2x256xf32>
    %199 = arith.select %197, %190, %198 : vector<2x256xi1>, vector<2x256xf32>
    %200 = arith.addf %184, %199 : vector<2x256xf32>
    %201 = vector.extract_strided_slice %200 {offsets = [0, 0], sizes = [1, 256], strides = [1, 1]} : vector<2x256xf32> to vector<1x256xf32>
    %202 = vector.extract_strided_slice %200 {offsets = [1, 0], sizes = [1, 256], strides = [1, 1]} : vector<2x256xf32> to vector<1x256xf32>
    %203 = arith.addf %201, %202 : vector<1x256xf32>
    %204 = vector.broadcast %76 : f32 to vector<1x256xf32>
    %205 = arith.addf %203, %204 : vector<1x256xf32>
    %206 = arith.negf %205 : vector<1x256xf32>
    %207 = math.exp %206 : vector<1x256xf32>
    %cst_50 = arith.constant 1.000000e+00 : f32
    %208 = vector.broadcast %cst_50 : f32 to vector<1x256xf32>
    %209 = arith.addf %208, %207 : vector<1x256xf32>
    %210 = arith.divf %208, %209 : vector<1x256xf32>
    %211 = vector.shape_cast %210 : vector<1x256xf32> to vector<1x1x256xf32>
    %212 = vector.broadcast %211 : vector<1x1x256xf32> to vector<1x4x256xf32>
    %213 = arith.mulf %29, %212 : vector<1x4x256xf32>
    %c0_51 = arith.constant 0 : index
    %c0_52 = arith.constant 0 : index
    %c0_53 = arith.constant 0 : index
    %214 = vector.load %arg7[%c0_51, %c0_52, %c0_53] : memref<1x4x256xf32, #tpu.memory_space<vmem>>, vector<1x4x256xf32>
    tpu.vector_store %arg7[%c0_51, %c0_52, %c0_53], %213 {strides = array<i32>} : memref<1x4x256xf32, #tpu.memory_space<vmem>>, vector<1x4x256xf32>,
    return
  }
  func.func @transform_0(%arg0: i32) -> (i32, i32, i32) {
    %c0_i32 = arith.constant 0 : i32
    %c0_i32_0 = arith.constant 0 : i32
    %c0_i32_1 = arith.constant 0 : i32
    return %arg0, %c0_i32, %c0_i32_0 : i32, i32, i32
  }
  func.func @transform_1(%arg0: i32) -> (i32, i32) {
    %c0_i32 = arith.constant 0 : i32
    %c0_i32_0 = arith.constant 0 : i32
    %c0_i32_1 = arith.constant 0 : i32
    return %c0_i32, %c0_i32_0 : i32, i32
  }
  func.func @transform_2(%arg0: i32) -> (i32, i32) {
    %c0_i32 = arith.constant 0 : i32
    %c0_i32_0 = arith.constant 0 : i32
    %c0_i32_1 = arith.constant 0 : i32
    return %c0_i32, %c0_i32_0 : i32, i32
  }
  func.func @transform_3(%arg0: i32) -> (i32, i32) {
    %c0_i32 = arith.constant 0 : i32
    %c0_i32_0 = arith.constant 0 : i32
    %c0_i32_1 = arith.constant 0 : i32
    return %c0_i32, %c0_i32_0 : i32, i32
  }
  func.func @transform_4(%arg0: i32) -> (i32, i32) {
    %c0_i32 = arith.constant 0 : i32
    %c0_i32_0 = arith.constant 0 : i32
    %c0_i32_1 = arith.constant 0 : i32
    return %c0_i32, %c0_i32_0 : i32, i32
  }
  func.func @transform_5(%arg0: i32) -> i32 {
    %c0_i32 = arith.constant 0 : i32
    %c0_i32_0 = arith.constant 0 : i32
    return %c0_i32 : i32
  }
  func.func @transform_6(%arg0: i32) -> (i32, i32, i32) {
    %c0_i32 = arith.constant 0 : i32
    %c0_i32_0 = arith.constant 0 : i32
    %c0_i32_1 = arith.constant 0 : i32
    return %arg0, %c0_i32, %c0_i32_0 : i32, i32, i32
  }
}

</mosaic_0001>

<bundles_post_ra>
// kernel: tpu_custom_call.1
= control target key start
LH: loop header
LB: loop body
LE: loop exit
PB: predicated region body
PF: predicated region fallthrough
CT: control target
= control target key end

     0   :  { %11 = vsyncpa [#allocation3], 0  ;;  %s1695_s0 = inlined_call_operand.hbm [shape: f32[2,4,256], index: 0, kind: input, shape index: {}]   ;;  %s1696_s1 = inlined_call_operand.vmem [shape: f32[4,2], index: 1, kind: input, shape index: {}]   ;;  %s1697_s2 = inlined_call_operand.vmem [shape: f32[1,2], index: 2, kind: input, shape index: {}]   ;;  %s1698_s3 = inlined_call_operand.vmem [shape: f32[2,4], index: 3, kind: input, shape index: {}]   ;;  %s1699_s4 = inlined_call_operand.vmem [shape: f32[1,4], index: 4, kind: input, shape index: {}]   ;;  %s1700_s5 = inlined_call_operand.vmem [shape: f32[19], index: 5, kind: input, shape index: {}]   ;;  %s1701_s6 = inlined_call_operand.hbm [shape: f32[2,4,256], index: 6, kind: output, shape index: {}]  }
   0x1   :  { %13 = vsyncpa [#allocation3 + $0x1], 0 }
   0x2   :  { %14 = vsyncpa [#allocation5], 0 }
   0x3   :  { %15 = vsyncpa [#allocation4], 0 }
   0x4   :  { %17 = vsyncpa [#allocation4 + $0x1], 0  ;;  %s1219_s21 = smov 0   ;;  %s1221_s22 = smov 0  }
   0x5   :  { %s1223_s23 = smov 0   ;;  %s1225_s24 = smov 0  }
   0x6 LB: > { %s1240_s25 = sadd.s32 4294967295, %s1168_s24   ;;  %s912_s26 = sadd.s32 4294967294, %s1168_s24   ;;  %s1168_s24 = sphi %s1225_s24, %s1734_s24   ;;  %s1164_s23 = sphi %s1223_s23, %s1733_s23   ;;  %s1160_s22 = sphi %s1221_s22, %s1732_s22   ;;  %s1156_s21 = sphi %s1219_s21, %s1731_s21  }
   0x7   : > { %p43_p0 = scmp.ne.s32.totalorder %s1160_s22, %s1156_s21  ;;  %p1702_p1 = scmp.eq.s32.totalorder %s1240_s25, 0 }
   0x8   : > { %p178_p3 = scmp.eq.s32.totalorder %s912_s26, 1  ;;  %p913_p5 = scmp.ge.s32.totalorder %s1168_s24, 1 }
   0x9   : > { %p1249_p4 = por %p1702_p1, %p43_p0  ;;  %p185_p7 = scmp.lt.s32.totalorder %s1168_s24, 3 }
   0xa   : > { %p1254_p6 = por %p178_p3, %p43_p0  ;;  %s210_s7 = sshll.u32 %s1700_s5, 4  ;;  %s211_s7 = int_to_ptr.vmem [resolvable:$true] %s210_s7 }
   0xb   : > { %s1705_s27 = scalar_select %p1249_p4, 1, 0 }
   0xc   : > { %s1706_s28 = scalar_select %p1254_p6, 1, 0 }
   0xd   : > { %p1262_p8 = pnand %p913_p5, %p185_p7  ;;  %s1270_s9 = sadd.s32 1, %s1168_s24  }
   0xe   : > { %s27_s11 = ssub.s32 %s1168_s24, %s1270_s9  ;;  %s30_s13 = sadd.s32 1, %s1164_s23 }
   0xf   : > { %p980_p10 = pneg %p1262_p8  ;;  %p1280_p12 = scmp.eq.s32.totalorder %s27_s11, 0 }
  0x10   : > { %p37_p13 = scmp.ne.s32.totalorder %s1164_s23, %s1160_s22  ;;  %s1053_s14 = scalar_lea.vmem %s211_s7, 16 }
  0x11   : > { %p1274_p11 = pnand %p980_p10, %p1702_p1  ;;  %p1054_p0 = scmp.ne.s32.totalorder %s211_s7, %s1053_s14 }
  0x12   : > { %p1061_p9 = scmp.lt.s32.totalorder %s211_s7, %s211_s7  ;;  %p1062_p2 = scmp.lt.s32.totalorder %s1053_s14, %s1053_s14 }
  0x13   : > { %p1055_p3 = pneg %p1274_p11 }
  0x14   : > { %p1063_p10 = por %p1062_p2, %p1061_p9 }
  0x15   : > { %p1056_p5 = pnand %p1055_p3, %p1054_p0 }
  0x17   : > { %p1057_p7 = pneg %p1056_p5 }
  0x19   : > { %p1064_p1 = pnand %p1063_p10, %p1057_p7 }
  0x1b   : > { %1067 = shalt.err (!%p1064_p1)
}
  0x1c   : > { %s1170_s15 = smov [#allocation6]   ;;  %p38_p2 = scmp.eq.s32.totalorder %s1168_s24, 0 }
  0x1d   : > { %983 = dma.vmem_to_smem (!%p1274_p11), %s211_s7, 16, %s1170_s15, [#allocation5]  }
  0x1e   : > { %s1294_s16 = scalar_select %p1280_p12, %s1164_s23, %s30_s13  }
  0x1f   : > { %p1710_p1 = scmp.eq.s32.totalorder %s1240_s25, 1  ;;  %p993_p0 = scmp.lt.s32.totalorder %s1168_s24, 2 }
  0x20   : > { %s221_s18 = sand.u32 1, %s1164_s23   ;;  %p39_p3 = por %p38_p2, %p37_p13 }
  0x21   : > { %p1302_p9 = por %p1710_p1, %p37_p13  ;;  %s916_s19 = sshll.u32 %s221_s18, 3 }
  0x22   : > { %s956_s20 = sshll.u32 %s1168_s24, 7  ;;  %s225_s7 = scalar_lea.vmem [#allocation2], %s916_s19 }
  0x23   : > { %s1711_s17 = scalar_select %p1302_p9, 1, 0 }
  0x24   : > { %s1315_s30 = scalar_lea.hbm %s1695_s0, %s956_s20  ;;  %s233_s10 = sshll.u32 %s225_s7, 4  ;;  %s1321_s10 = int_to_ptr.vmem [resolvable:$true] %s233_s10 }
  0x25   : > { %p1317_p11 = pnand %p993_p0, %p39_p3  ;;  %s222_s12 = scalar_lea.sflag [#allocation3], %s221_s18 }
  0x26   : > { %s1068_s13 = scalar_lea.hbm %s1315_s30, 128  ;;  %s1073_s19 = scalar_lea.hbm %s1695_s0, 256 }
  0x27   : > { %p1069_p12 = scmp.ne.s32.totalorder %s1315_s30, %s1068_s13  ;;  %p1070_p13 = pneg %p1317_p11 }
  0x28   : > { %p1074_p10 = scmp.lt.u32.totalorder %s1315_s30, %s1695_s0  ;;  %p1075_p2 = scmp.lt.u32.totalorder %s1073_s19, %s1068_s13 }
  0x29   : > { %p1071_p5 = pnand %p1070_p13, %p1069_p12  ;;  %p1077_p0 = scmp.lt.u32.totalorder %s1068_s13, %s1315_s30 }
  0x2a   : > { %p1076_p1 = por %p1075_p2, %p1074_p10 }
  0x2b   : > { %p1072_p7 = pneg %p1071_p5 }
  0x2c   : > { %p1078_p3 = por %p1077_p0, %p1076_p1 }
  0x2e   : > { %p1079_p6 = pnand %p1078_p3, %p1072_p7 }
  0x30   : > { %1082 = shalt.err (!%p1079_p6)
}
  0x31   : > { %s1083_s18 = scalar_lea.vmem %s1321_s10, 128  ;;  %s1171_s29 = smov [#allocation2]  }
  0x32   : > { %p1084_p12 = scmp.ne.s32.totalorder %s1321_s10, %s1083_s18  ;;  %s1088_s7 = sshll.u32 %s1171_s29, 4  ;;  %s1089_s7 = int_to_ptr.vmem [resolvable:$false] %s1088_s7 }
  0x33   : > { %s1090_s14 = scalar_lea.vmem %s1089_s7, 256  ;;  %p1091_p4 = scmp.lt.s32.totalorder %s1321_s10, %s1089_s7 }
  0x34   : > { %p1086_p5 = pnand %p1084_p12, %p1070_p13  ;;  %p1092_p10 = scmp.lt.s32.totalorder %s1090_s14, %s1083_s18 }
  0x36   : > { %p1087_p9 = pneg %p1086_p5  ;;  %p1093_p2 = por %p1092_p10, %p1091_p4 }
  0x38   : > { %p1094_p1 = pnand %p1093_p2, %p1087_p9 }
  0x3a   : > { %1097 = shalt.err (!%p1094_p1)
}
  0x3b   : > { %987 = dma.hbm_to_vmem [thread:$0]  (!%p1317_p11), %s1315_s30, 128, %s1321_s10, %s222_s12  }
  0x3c   : > { %242 = sbr.rel (%p1262_p8) target bundleno = 1040 (0x410), region = 44  ;;  %s1351_s13 = sand.u32 (!%p1262_p8), 1, %s1160_s22  }
  0x3d   : > { %s920_s15 = sshll.u32 (!%p1262_p8), %s1351_s13, 3  ;;  %s245_s19 = scalar_lea.sflag (!%p1262_p8), [#allocation3], %s1351_s13 }
  0x3e   : > { %s248_s20 = scalar_lea.vmem (!%p1262_p8), [#allocation2], %s920_s15  ;;  %p1713_p4 = scmp.ne.s32.totalorder (!%p1262_p8), %s1705_s27, 0 }
  0x43   : > { %1143 = dma.done.wait (%p1713_p4), %s245_s19, 128  }
  0x44   : > { %1145 = vsyncadd (%p1713_p4), %s245_s19, 4294967168  ;;  %p1714_p6 = scmp.eq.s32.totalorder %s1240_s25, 0 }
  0x46   : > { %1147 = dma.done.wait (%p1714_p6), [#allocation5], 16   ;;  %p1715_p8 = pmov %p1714_p6 }
  0x48   : > { %1149 = vsyncadd (%p1715_p8), [#allocation5], 4294967280 }
  0x49   : > { %257 = sfence }
  0x4a   : > { %v1365_v0 = vld [vmem:[%s248_s20] sm:$0xff]  ;;  %vm286_vm0 = vcmask 1043456   ;;  %v1172_v9 = vmov 0.0   ;;  %vm1173_vm1 = vmmov 0   ;;  %v300_v10 = vlaneseq  ;;  %s1175_s29 = smov 17   ;;  %s1176_s7 = smov 16  }
  0x4b   : > { %v284_v1 = vcombine.high %v1365_v0, %v1365_v0  ;;  %v287_v2 = vsel %vm286_vm0, %v1365_v0, 0.0  ;;  %v294_v4 = vsel %vm286_vm0, %v1365_v0, -inf  ;;  %v315_v8 = vld [vmem:[%s1696_s1] sm:$0xf]  ;;  %962 = vmatprep.subr.mxu0 %v1172_v9  ;;  %964 = vmatprep.mubr.msk.f32.mxu0 %vm1173_vm1, %v1172_v9  ;;  %vm313_vm2 = vcmask 1040384   ;;  %s1177_s14 = smov 127  }
  0x4c   : > { %963 = vmatpush3.msk.msra.mxu0 %vm286_vm0, %v315_v8  ;;  %967 = vmatprep.subr.mxu1 %v1172_v9  ;;  %v1379_v11 = vand.u32 127, %v300_v10  ;;  %v1381_v12 = vshrl.u32 %v300_v10, 7  ;;  %vm323_vm3 = vcmask 31744   ;;  %v405_v20 = vld [vmem:[%s1698_s3] sm:$0x3]  ;;  %vm412_vm4 = vcmask 1041408  }
  0x4d   : > { %v288_v3 = vsel %vm286_vm0, %v284_v1, 0.0  ;;  %v295_v5 = vsel %vm286_vm0, %v284_v1, -inf  ;;  %969 = vmatprep.mubr.msk.f32.mxu1 %vm1173_vm1, %v1172_v9  ;;  %968 = vmatpush3.msk.msra.mxu1 %vm412_vm4, %v405_v20  ;;  %v923_v21 = vld [vmem:[%s1697_s2] ss:$0 sm:$0xff]  ;;  %vm408_vm5 = vcmask 15360   ;;  %s1178_s19 = smov 15  }
  0x4e   : > { %v289_v6 = vadd.f32 %v288_v3, %v287_v2  ;;  %v296_v7 = vmax.f32 %v294_v4, %v295_v5  ;;  %v304_v14 = vsub.s32 %v1379_v11, %v1381_v12  ;;  %v406_v28 = vld [vmem:[%s1699_s4] sm:$0x1]  ;;  %v1396_v36 = vsub.s32 0, %v1381_v12  ;;  %s1179_s20 = smov 113   ;;  %s1180_s27 = smov 1  }
  0x4f   : > { %v407_v29 = vmul.f32 2.0, %v406_v28  ;;  %v1174_v39 = vmov 839922192   ;;  %s1181_s8 = smov 112   ;;  %s1182_s30 = smov 111   ;;  %vm596_vm10 = vcmp.lt.s32.totalorder %v1381_v12, 1 }
  0x50   : > { %290 = vadd.xlane.f32.xlu0 %v289_v6  ;;  %v501_v40 = vunpack.c.l.s4 %v1174_v39  ;;  %s575_s10 = sld [smem:[#allocation6]]  ;;  %s939_s11 = sld [smem:[#allocation6 + $0x9]]  ;;  %vm625_vm11 = vcmp.lt.s32.totalorder %v1379_v11, 16  ;;  %vm601_vm12 = vcmp.lt.s32.totalorder %v1379_v11, 17  ;;  %vm645_vm1 = vcmp.lt.s32.totalorder %v1379_v11, 15 }
  0x51   : > { %s1437_s12 = sld [smem:[#allocation6 + $0x1]]  ;;  %s1439_s26 = sld [smem:[#allocation6 + $0xa]] }
  0x52   : > { %v502_v41 = vunpack.c.0.s8 %v501_v40  ;;  %s1443_s18 = sld [smem:[#allocation6 + $0x2]]  ;;  %p1728_p11 = scmp.ne.s32.totalorder %s1711_s17, 0 }
  0x54   : > { %297 = vmax.xlane.f32.xlu0 %v296_v7  ;;  %v505_v42 = vsub.s32 %v502_v41, %v1381_v12 }
  0xdd   : > { %v291_v13 = vpop.xlane.xlu0 %290 }
  0xde   : > { %v293_v15 = vmul.f32 0.00390625, %v291_v13 }
  0xe0   : > { %v305_v17 = vrot.slane %v293_v15, %v304_v14 }
  0xe1   : > { %v298_v16 = vpop.xlane.xlu0 %297 }
  0xe2   : > { %v311_v18 = vrot.slane %v298_v16, %v304_v14 }
  0xe4   : > { %v314_v19 = vsel %vm313_vm2, %v305_v17, %v311_v18  ;;  %v545_v17 = vadd.s32 128, %v1379_v11  ;;  %v546_v18 = vcvt.s32.f32 %v1379_v11 }
  0xe5   : > { %965 = vmatmul.mubr.msk.f32.vlgmr.msra.gmra.mrb[0].mxu0 %vm323_vm3, %v314_v19 }
  0xe6   : > { %v547_v19 = vcvt.s32.f32 %v545_v17  ;;  %v548_v20 = vadd.f32 0.5, %v546_v18 }
 0x1b8   : > { %v396_v22 = vpop.f32.mrb[0].mxu0 }
 0x1b9   : > { %v397_v23 = vadd.f32 %v923_v21, %v396_v22  ;;  %v966_v24 = vpop.f32.mrb[1].mxu0  ;;  %v549_v21 = vadd.f32 0.5, %v547_v19  ;;  %v551_v22 = vmul.f32 0.0625, %v548_v20 }
 0x1bb   : > { %v400_v25 = vmax.f32 %v397_v23, 0.0  ;;  %v552_v23 = vmul.f32 0.0625, %v549_v21  ;;  %v553_v24 = vfloor.f32 %v551_v22 }
 0x1bd   : > { %v402_v26 = vrot.slane %v400_v25, 1 }
 0x1bf   : > { %v404_v27 = vadd.f32 %v402_v26, %v400_v25  ;;  %v554_v25 = vfloor.f32 %v552_v23  ;;  %v555_v26 = vmul.f32 16.0, %v553_v24 }
 0x1c1   : > { %970 = vmatmul.mubr.msk.f32.vlgmr.msra.gmra.mrb[0].mxu1 %vm408_vm5, %v404_v27  ;;  %v556_v27 = vmul.f32 16.0, %v554_v25  ;;  %v557_v28 = vsub.f32 %v546_v18, %v555_v26 }
 0x1c3   : > { %vm563_vm6 = vcmp.ge.f32.partialorder %v557_v28, 16.0  ;;  %vm559_vm8 = vcmp.lt.f32.partialorder %v557_v28, 0.0 }
 0x294   : > { %v482_v30 = vpop.f32.mrb[0].mxu1 }
 0x295   : > { %v483_v31 = vadd.f32 %v482_v30, %v407_v29  ;;  %v971_v32 = vpop.f32.mrb[1].mxu1  ;;  %v558_v29 = vsub.f32 %v547_v19, %v556_v27  ;;  %v565_v30 = vadd.f32 1.0, %v553_v24 }
 0x296   : > { %v566_v32 = vadd.f32 1.0, %v554_v25 }
 0x297   : > { %v928_v33 = vmul.f32 -1.442695, %v483_v31  ;;  %vm564_vm7 = vcmp.ge.f32.partialorder %v558_v29, 16.0  ;;  %vm560_vm9 = vcmp.lt.f32.partialorder %v558_v29, 0.0 }
 0x299   : > { %1041 = vpow2.f32 %v928_v33  ;;  %v929_v33 = vadd.f32 -1.0, %v553_v24 }
 0x2a3   : > { %v1042_v34 = vpop.eup %1041 }
 0x2a4   : > { %v489_v35 = vadd.f32 1.0, %v1042_v34  ;;  %v930_v34 = vadd.f32 -1.0, %v554_v25 }
 0x2a6   : > { %1043 = vrcp.f32 %v489_v35  ;;  %v567_v35 = vsel %vm563_vm6, %v565_v30, %v553_v24 }
 0x2a7   : > { %v1435_v39 = vsel %vm559_vm8, %v929_v33, %v567_v35 }
 0x2a8   : > { %vm609_vm13 = vcmp.ge.f32.partialorder %v1435_v39, 0.5 }
 0x2b0   : > { %v1044_v37 = vpop.eup %1043 }
 0x2b1   : > { %v495_v38 = vrot.slane %v1044_v37, %v1396_v36  ;;  %v568_v37 = vsel %vm564_vm7, %v566_v32, %v554_v25  ;;  %vm669_vm7 = vcmp.lt.s32.totalorder %v1379_v11, 1 }
 0x2b2   : > { %v1441_v40 = vsel %vm560_vm9, %v930_v34, %v568_v37  ;;  %vm696_vm9 = vcmp.lt.s32.totalorder %v1379_v11, 127 }
 0x2b3   : > { %497 = vbcast.lane.b32.xlu1 %v495_v38, 256  ;;  %vm610_vm14 = vcmp.ge.f32.partialorder %v1441_v40, 0.5 }
 0x325   : > { %v498_v43 = vpop.permute.xlu1 %497 }
 0x326   : > { %v506_v44 = vrot.slane %v498_v43, %v505_v42  ;;  %v571_v42 = vmul.f32 16.0, %v1435_v39  ;;  %v572_v43 = vmul.f32 16.0, %v1441_v40 }
 0x328   : > { %v1401_v45 = vmul.f32 %v506_v44, %v1365_v0 }
 0x32a   : > { %v510_v46 = vcombine.high %v1401_v45, %v1401_v45  ;;  %v512_v47 = vsel %vm286_vm0, %v1401_v45, 0.0  ;;  %v529_v48 = vsel %vm286_vm0, %v1401_v45, -inf }
 0x32b   : > { %v513_v49 = vrot.slane %v512_v47, 4  ;;  %v530_v50 = vrot.slane %v529_v48, 4 }
 0x32c   : > { %v519_v51 = vsel %vm286_vm0, %v510_v46, 0.0  ;;  %v536_v52 = vsel %vm286_vm0, %v510_v46, -inf  ;;  %v1456_v46 = vsub.f32 %v546_v18, %v571_v42 }
 0x32d   : > { %v514_v53 = vadd.f32 %v513_v49, %v512_v47  ;;  %v520_v54 = vrot.slane %v519_v51, 4  ;;  %v531_v55 = vmax.f32 %v529_v48, %v530_v50  ;;  %v537_v56 = vrot.slane %v536_v52, 4 }
 0x32e   : > { %v604_v47 = vstv %s575_s10  ;;  %v605_v48 = vstv %s939_s11  ;;  %v1458_v49 = vsub.f32 %v547_v19, %v572_v43  ;;  %v628_v50 = vstv %s1437_s12  ;;  %s1497_s10 = sld [smem:[#allocation6 + $0xf]]  ;;  %s1551_s12 = sld [smem:[#allocation6 + $0x10]] }
 0x32f   : > { %v515_v57 = vrot.slane %v514_v53, 2  ;;  %v521_v58 = vadd.f32 %v520_v54, %v519_v51  ;;  %v532_v59 = vrot.slane %v531_v55, 2  ;;  %v538_v60 = vmax.f32 %v536_v52, %v537_v56  ;;  %s1549_s11 = sld [smem:[#allocation6 + $0x7]] }
 0x330   : > { %v629_v51 = vstv %s1439_s26  ;;  %vm611_vm15 = vcmp.ge.f32.partialorder %v1456_v46, 0.5  ;;  %vm612_vm0 = vcmp.ge.f32.partialorder %v1458_v49, 0.5  ;;  %vm654_vm3 = vcmp.le.f32.partialorder %v1458_v49, 14.5  ;;  %s1575_s26 = sld [smem:[#allocation6 + $0x8]] }
 0x331   : > { %v516_v61 = vadd.f32 %v515_v57, %v514_v53  ;;  %v522_v62 = vrot.slane %v521_v58, 2  ;;  %v533_v63 = vmax.f32 %v531_v55, %v532_v59  ;;  %v539_v0 = vrot.slane %v538_v60, 2  ;;  %vm1503_vm4 = vmand %vm609_vm13, %vm611_vm15 }
 0x332   : > { %v606_v53 = vsel %vm596_vm10, %v604_v47, %v605_v48  ;;  %v648_v55 = vstv %s1443_s18  ;;  %v630_v57 = vsel %vm596_vm10, %v628_v50, %v629_v51  ;;  %vm1513_vm5 = vmand %vm610_vm14, %vm612_vm0  ;;  %s1577_s18 = sld [smem:[#allocation6 + $0x11]] }
 0x333   : > { %v517_v1 = vrot.slane %v516_v61, 1  ;;  %v523_v2 = vadd.f32 %v522_v62, %v521_v58  ;;  %v534_v3 = vrot.slane %v533_v63, 1  ;;  %v540_v4 = vmax.f32 %v538_v60, %v539_v0  ;;  %vm1534_vm8 = vmand %vm610_vm14, %vm654_vm3 }
 0x335   : > { %v518_v5 = vadd.f32 %v517_v1, %v516_v61  ;;  %v524_v6 = vrot.slane %v523_v2, 1  ;;  %v541_v7 = vrot.slane %v540_v4, 1  ;;  %v535_v10 = vmax.f32 %v533_v63, %v534_v3 }
 0x337   : > { %v525_v8 = vadd.f32 %v524_v6, %v523_v2  ;;  %v527_v9 = vmul.f32 0.25, %v518_v5  ;;  %v542_v14 = vmax.f32 %v540_v4, %v541_v7 }
 0x339   : > { %v528_v13 = vmul.f32 0.25, %v525_v8  ;;  %v1412_v15 = vsel %vm313_vm2, %v527_v9, %v535_v10 }
 0x33a   : > { %597 = vrot.lane.b32.xlu1 %v1412_v15, %s1175_s29 }
 0x33b   : > { %v1416_v16 = vsel %vm313_vm2, %v528_v13, %v542_v14  ;;  %vm653_vm2 = vcmp.le.f32.partialorder %v1456_v46, 14.5 }
 0x33c   : > { %599 = vrot.lane.b32.xlu0 %v1416_v16, %s1175_s29  ;;  %s1445_s29 = sld [smem:[#allocation6 + $0xb]]  ;;  %vm1525_vm6 = vmand %vm609_vm13, %vm653_vm2 }
 0x33e   : > { %621 = vrot.lane.b32.xlu1 %v1412_v15, %s1176_s7 }
 0x340   : > { %692 = vrot.lane.b32.xlu0 %v1412_v15, %s1177_s14 }
 0x342   : > { %641 = vrot.lane.b32.xlu1 %v1412_v15, %s1178_s19  ;;  %v649_v56 = vstv %s1445_s29  ;;  %s948_s29 = sld [smem:[#allocation6 + $0x12]] }
 0x343   : > { %v650_v62 = vsel %vm596_vm10, %v648_v55, %v649_v56 }
 0x344   : > { %712 = vrot.lane.b32.xlu0 %v1412_v15, %s1179_s20 }
 0x346   : > { %665 = vrot.lane.b32.xlu1 %v1412_v15, %s1180_s27 }
 0x348   : > { %736 = vrot.lane.b32.xlu0 %v1412_v15, %s1181_s8  ;;  %v786_v49 = vstv %s948_s29 }
 0x34a   : > { %623 = vrot.lane.b32.xlu1 %v1416_v16, %s1176_s7  ;;  %s1451_s7 = sld [smem:[#allocation6 + $0x3]] }
 0x34c   : > { %756 = vrot.lane.b32.xlu0 %v1412_v15, %s1182_s30 }
 0x34e   : > { %643 = vrot.lane.b32.xlu1 %v1416_v16, %s1178_s19  ;;  %s1465_s19 = sld [smem:[#allocation6 + $0x4]] }
 0x350   : > { %v672_v3 = vstv %s1451_s7  ;;  %s957_s7 = sshll.u32 %s1240_s25, 7  ;;  %s1183_s25 = smov [#allocation7]  }
 0x352   : > { %667 = vrot.lane.b32.xlu1 %v1416_v16, %s1180_s27  ;;  %s1474_s27 = sld [smem:[#allocation6 + $0x5]] }
 0x354   : > { %v685_v20 = vstv %s1465_s19 }
 0x356   : > { %694 = vrot.lane.b32.xlu1 %v1416_v16, %s1177_s14  ;;  %s1453_s14 = sld [smem:[#allocation6 + $0xc]] }
 0x358   : > { %v699_v25 = vstv %s1474_s27 }
 0x35a   : > { %714 = vrot.lane.b32.xlu1 %v1416_v16, %s1179_s20  ;;  %s1467_s20 = sld [smem:[#allocation6 + $0xd]] }
 0x35c   : > { %v673_v4 = vstv %s1453_s14  ;;  %s281_s14 = scalar_lea.vmem [#allocation7], %s920_s15  ;;  %s1102_s15 = sshll.u32 %s1183_s25, 4  ;;  %s1103_s15 = int_to_ptr.vmem [resolvable:$false] %s1102_s15 }
 0x35d   : > { %v674_v19 = vsel %vm596_vm10, %v672_v3, %v673_v4  ;;  %s830_s19 = sshll.u32 %s281_s14, 4  ;;  %s1653_s19 = int_to_ptr.vmem [resolvable:$true] %s830_s19 }
 0x35e   : > { %738 = vrot.lane.b32.xlu1 %v1416_v16, %s1181_s8  ;;  %s1476_s8 = sld [smem:[#allocation6 + $0xe]]  ;;  %p1105_p0 = scmp.lt.s32.totalorder %s1653_s19, %s1103_s15 }
 0x360   : > { %v686_v21 = vstv %s1467_s20 }
 0x362   : > { %758 = vrot.lane.b32.xlu1 %v1416_v16, %s1182_s30  ;;  %s1495_s30 = sld [smem:[#allocation6 + $0x6]] }
 0x364   : > { %v700_v26 = vstv %s1476_s8  ;;  %s1651_s8 = scalar_lea.hbm %s1701_s6, %s957_s7 }
 0x3ac   : > { %v598_v31 = vpop.permute.xlu1 %597 }
 0x3ae   : > { %v600_v52 = vpop.permute.xlu0 %599 }
 0x3af   : > { %v602_v60 = vsel %vm601_vm12, %v598_v31, %v600_v52  ;;  %v603_v61 = vsel %vm601_vm12, %v600_v52, %v598_v31  ;;  %vm724_vm12 = vcmp.le.f32.partialorder %v1435_v39, 14.5 }
 0x3b0   : > { %v622_v38 = vpop.permute.xlu1 %621  ;;  %v607_v6 = vmul.f32 %v606_v53, %v603_v61  ;;  %v608_v7 = vmul.f32 %v606_v53, %v602_v60  ;;  %v743_v61 = vstv %s1549_s11  ;;  %s1104_s11 = scalar_lea.vmem %s1103_s15, 256 }
 0x3b2   : > { %v693_v10 = vpop.permute.xlu0 %692  ;;  %v619_v27 = vsel %vm1503_vm4, %v607_v6, 0.0  ;;  %v620_v28 = vsel %vm1513_vm5, %v608_v7, 0.0 }
 0x3b4   : > { %v642_v41 = vpop.permute.xlu1 %641 }
 0x3b6   : > { %v713_v42 = vpop.permute.xlu0 %712 }
 0x3b8   : > { %v1449_v44 = vpop.permute.xlu1 %665 }
 0x3ba   : > { %v737_v3 = vpop.permute.xlu0 %736 }
 0x3bc   : > { %v624_v54 = vpop.permute.xlu1 %623 }
 0x3bd   : > { %v626_v58 = vsel %vm625_vm11, %v622_v38, %v624_v54  ;;  %v627_v59 = vsel %vm625_vm11, %v624_v54, %v622_v38  ;;  %v719_v38 = vstv %s1495_s30  ;;  %v687_v54 = vsel %vm596_vm10, %v685_v20, %v686_v21  ;;  %s816_s30 = scalar_lea.sflag [#allocation4], %s1351_s13 }
 0x3be   : > { %v631_v0 = vmul.f32 %v630_v57, %v627_v59  ;;  %v632_v1 = vmul.f32 %v630_v57, %v626_v58  ;;  %vm716_vm11 = vcmp.lt.s32.totalorder %v1379_v11, 113  ;;  %v688_v63 = vmul.f32 %v687_v54, %v1412_v15 }
 0x3c0   : > { %v644_v2 = vpop.permute.xlu1 %643  ;;  %v637_v22 = vsel %vm609_vm13, %v631_v0, 0.0  ;;  %v638_v23 = vsel %vm610_vm14, %v632_v1, 0.0  ;;  %vm725_vm13 = vcmp.le.f32.partialorder %v1441_v40, 14.5  ;;  %v689_v0 = vmul.f32 %v687_v54, %v1416_v16  ;;  %vm1598_vm14 = vmand %vm724_vm12, %vm611_vm15 }
 0x3c1   : > { %v646_v8 = vsel %vm645_vm1, %v642_v41, %v644_v2  ;;  %v647_v9 = vsel %vm645_vm1, %v644_v2, %v642_v41  ;;  %v639_v35 = vadd.f32 %v637_v22, %v619_v27  ;;  %v640_v37 = vadd.f32 %v638_v23, %v620_v28  ;;  %vm1607_vm4 = vmand %vm725_vm13, %vm612_vm0  ;;  %v757_v27 = vpop.permute.xlu0 %756 }
 0x3c2   : > { %v651_v14 = vmul.f32 %v650_v62, %v647_v9  ;;  %v652_v17 = vmul.f32 %v650_v62, %v646_v8  ;;  %v720_v41 = vstv %s1497_s10  ;;  %v744_v62 = vstv %s1551_s12  ;;  %s1098_s10 = scalar_lea.vmem %s1653_s19, 128 }
 0x3c3   : > { %v721_v55 = vsel %vm596_vm10, %v719_v38, %v720_v41  ;;  %vm740_vm1 = vcmp.lt.s32.totalorder %v1379_v11, 112  ;;  %v745_v8 = vsel %vm596_vm10, %v743_v61, %v744_v62  ;;  %p1099_p9 = scmp.ne.s32.totalorder %s1653_s19, %s1098_s10  ;;  %p1106_p3 = scmp.lt.s32.totalorder %s1104_s11, %s1098_s10 }
 0x3c4   : > { %v668_v24 = vpop.permute.xlu1 %667  ;;  %v661_v31 = vsel %vm1525_vm6, %v651_v14, 0.0  ;;  %v662_v32 = vsel %vm1534_vm8, %v652_v17, 0.0  ;;  %v763_v14 = vstv %s1575_s26  ;;  %v764_v17 = vstv %s1577_s18 }
 0x3c5   : > { %v670_v29 = vsel %vm669_vm7, %v1449_v44, %v668_v24  ;;  %v671_v30 = vsel %vm669_vm7, %v668_v24, %v1449_v44  ;;  %v701_v44 = vsel %vm596_vm10, %v699_v25, %v700_v26  ;;  %v663_v50 = vadd.f32 %v661_v31, %v639_v35  ;;  %p1100_p13 = pnand %p1099_p9, %p1728_p11  ;;  %p1107_p12 = por %p1106_p3, %p1105_p0 }
 0x3c6   : > { %v675_v33 = vmul.f32 %v674_v19, %v671_v30  ;;  %v676_v34 = vmul.f32 %v674_v19, %v670_v29  ;;  %v664_v51 = vadd.f32 %v662_v32, %v640_v37  ;;  %v765_v26 = vsel %vm596_vm10, %v763_v14, %v764_v17  ;;  %vm769_vm10 = vmand %vm725_vm13, %vm654_vm3 }
 0x3c7   : > { %p1101_p7 = pneg %p1100_p13 }
 0x3c8   : > { %v681_v43 = vsel %vm611_vm15, %v675_v33, 0.0  ;;  %v682_v47 = vsel %vm612_vm0, %v676_v34, 0.0  ;;  %v695_v48 = vpop.permute.xlu1 %694  ;;  %vm760_vm15 = vcmp.lt.s32.totalorder %v1379_v11, 111  ;;  %vm768_vm0 = vmand %vm724_vm12, %vm653_vm2 }
 0x3c9   : > { %v697_v52 = vsel %vm696_vm9, %v693_v10, %v695_v48  ;;  %v698_v53 = vsel %vm696_vm9, %v695_v48, %v693_v10  ;;  %v683_v56 = vadd.f32 %v681_v43, %v663_v50  ;;  %v684_v57 = vadd.f32 %v682_v47, %v664_v51  ;;  %p1108_p5 = pnand %p1107_p12, %p1101_p7 }
 0x3ca   : > { %v702_v58 = vmul.f32 %v701_v44, %v697_v52  ;;  %v703_v59 = vmul.f32 %v701_v44, %v698_v53 }
 0x3cb   : > { %v690_v15 = vadd.f32 %v688_v63, %v683_v56  ;;  %v691_v7 = vadd.f32 %v689_v0, %v684_v57 }
 0x3cc   : > { %v715_v60 = vpop.permute.xlu1 %714  ;;  %v708_v9 = vsel %vm653_vm2, %v702_v58, 0.0  ;;  %v709_v10 = vsel %vm654_vm3, %v703_v59, 0.0 }
 0x3cd   : > { %v717_v1 = vsel %vm716_vm11, %v713_v42, %v715_v60  ;;  %v718_v2 = vsel %vm716_vm11, %v715_v60, %v713_v42  ;;  %v710_v24 = vadd.f32 %v708_v9, %v690_v15  ;;  %v711_v25 = vadd.f32 %v709_v10, %v691_v7 }
 0x3ce   : > { %v722_v5 = vmul.f32 %v721_v55, %v717_v1  ;;  %v723_v6 = vmul.f32 %v721_v55, %v718_v2 }
 0x3d0   : > { %v739_v13 = vpop.permute.xlu1 %738  ;;  %v732_v20 = vsel %vm1598_vm14, %v722_v5, 0.0  ;;  %v733_v21 = vsel %vm1607_vm4, %v723_v6, 0.0 }
 0x3d1   : > { %v741_v18 = vsel %vm740_vm1, %v737_v3, %v739_v13  ;;  %v742_v19 = vsel %vm740_vm1, %v739_v13, %v737_v3  ;;  %v734_v31 = vadd.f32 %v732_v20, %v710_v24  ;;  %v735_v32 = vadd.f32 %v733_v21, %v711_v25 }
 0x3d2   : > { %v746_v22 = vmul.f32 %v745_v8, %v741_v18  ;;  %v747_v23 = vmul.f32 %v745_v8, %v742_v19 }
 0x3d4   : > { %v752_v28 = vsel %vm724_vm12, %v746_v22, 0.0  ;;  %v753_v29 = vsel %vm725_vm13, %v747_v23, 0.0  ;;  %v759_v30 = vpop.permute.xlu1 %758 }
 0x3d5   : > { %v761_v12 = vsel %vm760_vm15, %v757_v27, %v759_v30  ;;  %v762_v33 = vsel %vm760_vm15, %v759_v30, %v757_v27  ;;  %v754_v46 = vadd.f32 %v752_v28, %v734_v31  ;;  %v755_v37 = vadd.f32 %v753_v29, %v735_v32 }
 0x3d6   : > { %v766_v34 = vmul.f32 %v765_v26, %v761_v12  ;;  %v767_v35 = vmul.f32 %v765_v26, %v762_v33 }
 0x3d8   : > { %v774_v39 = vsel %vm768_vm0, %v766_v34, 0.0  ;;  %v775_v38 = vsel %vm769_vm10, %v767_v35, 0.0 }
 0x3d9   : > { %v776_v41 = vadd.f32 %v774_v39, %v754_v46  ;;  %v777_v42 = vadd.f32 %v775_v38, %v755_v37 }
 0x3db   : > { %v780_v43 = vrot.slane %v776_v41, 1  ;;  %v781_v47 = vrot.slane %v777_v42, 1 }
 0x3dd   : > { %v784_v44 = vadd.f32 %v780_v43, %v776_v41  ;;  %v785_v40 = vadd.f32 %v781_v47, %v777_v42 }
 0x3df   : > { %v787_v48 = vadd.f32 %v786_v49, %v784_v44  ;;  %v788_v50 = vadd.f32 %v786_v49, %v785_v40 }
 0x3e1   : > { %v949_v51 = vmul.f32 -1.442695, %v787_v48  ;;  %v950_v11 = vmul.f32 -1.442695, %v788_v50 }
 0x3e3   : > { %1045 = vpow2.f32 %v949_v51 }
 0x3e4   : > { %1047 = vpow2.f32 %v950_v11 }
 0x3ed   : > { %v1046_v52 = vpop.eup %1045 }
 0x3ee   : > { %v1048_v53 = vpop.eup %1047  ;;  %v795_v54 = vadd.f32 1.0, %v1046_v52 }
 0x3ef   : > { %v796_v55 = vadd.f32 1.0, %v1048_v53 }
 0x3f0   : > { %1049 = vrcp.f32 %v795_v54 }
 0x3f1   : > { %1051 = vrcp.f32 %v796_v55 }
 0x3fa   : > { %v1050_v56 = vpop.eup %1049 }
 0x3fb   : > { %v1052_v57 = vpop.eup %1051  ;;  %v804_v58 = vrot.slane %v1050_v56, %v1396_v36 }
 0x3fc   : > { %v808_v59 = vrot.slane %v1052_v57, %v1396_v36 }
 0x3fe   : > { %v811_v60 = vcombine.low %v804_v58, %v808_v59 }
 0x400   : > { %v813_v61 = vmul.f32 %v811_v60, %v1401_v45 }
 0x402   : > { %814 = vst [vmem:[%s281_s14] sm:$0xff] %v813_v61 }
 0x403   : > { %1111 = shalt.err (!%p1108_p5)
}
 0x404   : > { %s1112_s13 = scalar_lea.hbm %s1651_s8, 128  ;;  %s1116_s18 = scalar_lea.hbm %s1701_s6, 256 }
 0x405   : > { %p1113_p10 = scmp.ne.s32.totalorder %s1651_s8, %s1112_s13  ;;  %p1117_p4 = scmp.lt.u32.totalorder %s1651_s8, %s1701_s6 }
 0x406   : > { %p1118_p6 = scmp.lt.u32.totalorder %s1116_s18, %s1112_s13  ;;  %p1120_p9 = scmp.lt.u32.totalorder %s1112_s13, %s1651_s8 }
 0x407   : > { %p1114_p2 = pnand %p1113_p10, %p1728_p11 }
 0x408   : > { %p1119_p8 = por %p1118_p6, %p1117_p4 }
 0x409   : > { %p1115_p1 = pneg %p1114_p2 }
 0x40a   : > { %p1121_p13 = por %p1120_p9, %p1119_p8 }
 0x40c   : > { %p1122_p7 = pnand %p1121_p13, %p1115_p1 }
 0x40e   : > { %1125 = shalt.err (!%p1122_p7)
}
 0x40f   : > { %978 = dma.vmem_to_hbm [thread:$0]  (%p1728_p11), %s1653_s19, 128, %s1651_s8, %s816_s30  }
 0x410 PF: > { %s842_s14 = sand.u32 1, %s1156_s21   ;;  %p1729_p0 = scmp.ne.s32.totalorder %s1706_s28, 0 }
 0x411   : > { %p1730_p3 = scmp.ge.s32.totalorder %s1168_s24, 2  ;;  %s843_s20 = scalar_lea.sflag [#allocation4], %s842_s14 }
 0x413   : > { %p989_p12 = pnand %p1730_p3, %p1729_p0 }
 0x415   : > { %1151 = dma.done.wait (!%p989_p12), %s843_s20, 128  }
 0x416   : > { %1153 = vsyncadd (!%p989_p12), %s843_s20, 4294967168  ;;  %p20_p5 = scmp.ge.s32.totalorder %s1270_s9, 4   ;;  %s1731_s21 = smov %s1160_s22 }
 0x417   : > { %s1732_s22 = smov %s1164_s23  ;;  %s1733_s23 = smov %s1294_s16 }
 0x418   : > { %s1734_s24 = smov %s1270_s9  ;;  %22 = sbr.rel (!%p20_p5) target bundleno = 6 (0x6), region = 94 }
 0x41f   :  { %848 = vsyncpa [#allocation3], 1 }
 0x420   :  { %850 = vsyncpa [#allocation3 + $0x1], 1 }
 0x421   :  { %851 = vsyncpa [#allocation4], 1 }
 0x422   :  { %853 = vsyncpa [#allocation4 + $0x1], 1 }
 0x423   :  { %854 = vsyncpa [#allocation5], 1 }
 0x424   :  { %856 = vsyncpa [#allocation5 + $0x1], 1 }

</bundles_post_ra>
